<compile_context>
chip_gen: v7x
topology: tpu7x:2x2x1
jax: 0.10.0
libtpu: 0.0.40
codegen_flags: <defaults>
</compile_context>

<pallas_src>
import jax
import jax.numpy as jnp
from jax import lax
from jax.experimental import pallas as pl
from jax.experimental.pallas import tpu as pltpu

LN_EPS = 1e-5   # torch.nn.LayerNorm default eps
LANES = 128     # TPU lane width


def _round_up(x: int, m: int) -> int:
    return (x + m - 1) // m * m


# ---------------------------------------------------------------------------
# Kernel
# ---------------------------------------------------------------------------
def classifier_head_kernel(cls_ref, w_ref, b_ref, o_ref):
    # cls_ref: (TB, E)        CLS-token features for this batch tile
    # w_ref:   (E, TN)  bf16  LN-affine-folded, transposed, class-padded weight
    # b_ref:   (1, TN)  f32   folded bias (zero in padded classes)
    # o_ref:   (TB, TN)       logits tile
    x = cls_ref[...].astype(jnp.float32)

    # LayerNorm statistics in f32, two-pass (x - mean)^2 like PyTorch (biased).
    mean = jnp.mean(x, axis=-1, keepdims=True)
    centered = x - mean
    var = jnp.mean(centered * centered, axis=-1, keepdims=True)
    x_hat = centered * lax.rsqrt(var + LN_EPS)

    # MXU matmul: bf16 operands, f32 accumulation, lane-dense padded class dim.
    logits = jnp.dot(x_hat.astype(w_ref.dtype), w_ref[...],
                     preferred_element_type=jnp.float32) + b_ref[...]
    o_ref[...] = logits.astype(o_ref.dtype)


# ---------------------------------------------------------------------------
# One-time (weight-load-time) parameter preparation
# ---------------------------------------------------------------------------
def prepare_params(ln_weight, ln_bias, lin_weight, lin_bias,
                   matmul_dtype=jnp.bfloat16):
    """Fold the LayerNorm affine into the linear layer, pad classes to a
    multiple of 128, transpose to (E, C_pad), cast to the MXU operand dtype.

        LN(x) @ W^T + b = x_hat @ (gamma[:, None] * W^T) + (beta @ W^T + b)

    The fold is done in f32 before the bf16 cast, so accuracy is unchanged.
    On v7x (only), accuracy permitting, matmul_dtype=jnp.float8_e4m3fn can be
    used to halve W's footprint again; keep bf16 on v5e/v6e (no fp8 MXU path).
    """
    C, E = lin_weight.shape
    C_pad = _round_up(C, LANES)

    gamma = ln_weight.astype(jnp.float32)
    beta = ln_bias.astype(jnp.float32)
    w_f32 = lin_weight.astype(jnp.float32)                     # (C, E)

    w_folded = gamma[:, None] * w_f32.T                        # (E, C) f32
    b_folded = lin_bias.astype(jnp.float32) + beta @ w_f32.T   # (C,)   f32

    w_t = jnp.zeros((E, C_pad), matmul_dtype).at[:, :C].set(
        w_folded.astype(matmul_dtype))
    b = jnp.zeros((1, C_pad), jnp.float32).at[0, :C].set(b_folded)
    return w_t, b, C


# ---------------------------------------------------------------------------
# Wrapper
# ---------------------------------------------------------------------------
def _pick_batch_tile(batch: int, batch_tile: int) -> int:
    batch_tile = max(8, _round_up(batch_tile, 8))
    if batch <= 8:
        return batch                       # single tile; cannot split below 8
    if batch <= 2 * batch_tile:
        # >= 2 grid steps so the "parallel" batch axis can shard across both
        # v7x TensorCores; costs only one extra ~0.35us step on single-TC chips.
        return min(_round_up(pl.cdiv(batch, 2), 8), batch_tile)
    return batch_tile


def classifier_head(x, w_t, b, num_classes, *, batch_tile=256, class_tile=4096,
                    out_dtype=None):
    """x: (B, S, E); (w_t, b) from prepare_params(); returns (B, num_classes).

    batch_tile: raise to 512 on v6e (single TC, 128 MiB VMEM) for very large
    batches; keep <=256 on v7x (64 MiB VMEM, and we want >=2 grid steps).
    class_tile: bound on the class-dim tile (multiple of 128); shrink for
    very large heads on VMEM-constrained generations.
    """
    B, S, E = x.shape
    E_w, C_pad = w_t.shape
    assert E_w == E, "w_t must be (E, C_pad) from prepare_params()"
    out_dtype = x.dtype if out_dtype is None else out_dtype

    TB = _pick_batch_tile(B, batch_tile)
    TN = min(C_pad, max(LANES, _round_up(class_tile, LANES)))
    grid = (pl.cdiv(B, TB), pl.cdiv(C_pad, TN))
    n_class_tiles = grid[1]

    # CLS extraction: when E is a multiple of 128, CLS features are columns
    # 0..E-1 of the row-major (B, S*E) view, so the BlockSpec DMA pulls the
    # CLS slice straight from HBM.  Otherwise fall back to a wrapper slice.
    if E % LANES == 0:
        cls_operand = x.reshape(B, S * E)      # free metadata reshape
    else:
        cls_operand = x[:, 0, :]               # fallback glue slice

    # Explicit scoped-VMEM budget: pipeline buffers + 30% headroom + 2 MiB for
    # intermediates / compiler scratch (conservatively assume double buffering).
    x_item = jnp.dtype(cls_operand.dtype).itemsize
    o_item = jnp.dtype(out_dtype).itemsize
    buf_bytes = (2 * TB * E * x_item
                 + 2 * E * TN * jnp.dtype(w_t.dtype).itemsize
                 + 2 * TN * jnp.dtype(b.dtype).itemsize
                 + 2 * TB * TN * o_item)
    vmem_bytes = int(1.3 * buf_bytes) + (2 << 20)
    vmem_bytes = max(vmem_bytes, 16 << 20)
    # If this clamp binds, shrink class_tile/batch_tile (v7x has only 64 MiB).
    vmem_bytes = min(vmem_bytes, 96 << 20)

    def call(single_buffer_consts: bool):
        const_kwargs = (dict(pipeline_mode=pl.Buffered(1))
                        if single_buffer_consts else {})
        return pl.pallas_call(
            classifier_head_kernel,
            out_shape=jax.ShapeDtypeStruct((B, C_pad), out_dtype),
            grid_spec=pltpu.PrefetchScalarGridSpec(
                num_scalar_prefetch=0,
                grid=grid,
                in_specs=[
                    # CLS tile: pipelined over batch, resident across the
                    # inner class axis.
                    pl.BlockSpec((TB, E), lambda i, j: (i, 0)),
                    # Folded weight / bias tiles (streamed over class axis).
                    pl.BlockSpec((E, TN), lambda i, j: (0, j), **const_kwargs),
                    pl.BlockSpec((1, TN), lambda i, j: (0, j), **const_kwargs),
                ],
                out_specs=pl.BlockSpec((TB, TN), lambda i, j: (i, j)),
            ),
            compiler_params=pltpu.CompilerParams(
                dimension_semantics=("parallel", "parallel"),
                vmem_limit_bytes=vmem_bytes),
        )(cls_operand, w_t, b)

    if n_class_tiles == 1:
        # W / bias blocks never change across the grid -> second pipeline
        # buffer is pure VMEM waste; request single buffering, fall back if
        # the installed jax rejects the pipeline_mode hint.
        try:
            logits_padded = call(True)
        except Exception:
            logits_padded = call(False)
    else:
        logits_padded = call(False)

    # Drop padded classes before any downstream softmax/argmax.
    return logits_padded[:, :num_classes]


# ---------------------------------------------------------------------------
# Pure-JAX reference (mirrors the PyTorch module)
# ---------------------------------------------------------------------------
def reference_head(x, ln_weight, ln_bias, lin_weight, lin_bias):
    cls_token = x[:, 0, :].astype(jnp.float32)
    mean = jnp.mean(cls_token, axis=-1, keepdims=True)
    var = jnp.mean((cls_token - mean) ** 2, axis=-1, keepdims=True)
    y = (cls_token - mean) / jnp.sqrt(var + LN_EPS) * ln_weight + ln_bias
    return y @ lin_weight.T + lin_bias


if __name__ == "__main__":
    def run_case(case_idx, B, S, E, C):
        key = jax.random.fold_in(jax.random.PRNGKey(0), case_idx)
        kx, kg, kb2, kw, kb = jax.random.split(key, 5)
        x = jax.random.normal(kx, (B, S, E), dtype=jnp.float32)
        # Non-trivial LN affine so the gamma/beta fold is actually exercised.
        ln_weight = 1.0 + 0.1 * jax.random.normal(kg, (E,), dtype=jnp.float32)
        ln_bias = 0.1 * jax.random.normal(kb2, (E,), dtype=jnp.float32)
        bound = 1.0 / float(E) ** 0.5
        lin_weight = jax.random.uniform(kw, (C, E), minval=-bound, maxval=bound,
                                        dtype=jnp.float32)
        lin_bias = jax.random.uniform(kb, (C,), minval=-bound, maxval=bound,
                                      dtype=jnp.float32)

        # One-time parameter preparation (outside the per-call path).
        w_t, bias, num_classes = prepare_params(ln_weight, ln_bias,
                                                lin_weight, lin_bias)

        out = classifier_head(x, w_t, bias, num_classes)
        out = jax.block_until_ready(out)

        ref = reference_head(x, ln_weight, ln_bias, lin_weight, lin_bias)
        assert out.shape == (B, C), f"bad shape {out.shape}"
        # bf16 matmul operands -> slightly looser tolerance than pure f32.
        assert jnp.allclose(out, ref, atol=2e-2, rtol=2e-2), \
            f"mismatch vs reference (case {case_idx})"

    # Fused-CLS DMA path (E % 128 == 0) with a 2-step batch grid.
    run_case(0, B=16, S=8, E=128, C=10)
    # Fallback wrapper-slice path (E not a multiple of 128).
    run_case(1, B=8, S=8, E=32, C=10)

    print("KERNEL_OK")
</pallas_src>

<mosaic_0001>
module attributes {stable_mosaic.version = 11 : i64} {
  func.func @classifier_head_kernel(%arg0: i32, %arg1: i32, %arg2: memref<8x128xf32, #tpu.memory_space<vmem>>, %arg3: memref<128x128xbf16, #tpu.memory_space<vmem>>, %arg4: memref<1x128xf32, #tpu.memory_space<vmem>>, %arg5: memref<8x128xf32, #tpu.memory_space<vmem>>) attributes {dimension_semantics = [#tpu.dimension_semantics<parallel>, #tpu.dimension_semantics<parallel>], iteration_bounds = array<i64: 2, 1>, scalar_prefetch = 0 : i64, scratch_operands = 0 : i64, tpu.core_type = #tpu.core_type<tc>, window_params = [{transform_indices = @transform_0, window_bounds = array<i64: 8, 128>}, {pipeline_mode = #tpu.pipeline_mode<synchronous>, transform_indices = @transform_1, window_bounds = array<i64: 128, 128>}, {pipeline_mode = #tpu.pipeline_mode<synchronous>, transform_indices = @transform_2, window_bounds = array<i64: 1, 128>}, {transform_indices = @transform_3, window_bounds = array<i64: 8, 128>}]} {
    %c0 = arith.constant 0 : index
    %c0_0 = arith.constant 0 : index
    %0 = vector.load %arg2[%c0, %c0_0] : memref<8x128xf32, #tpu.memory_space<vmem>>, vector<8x128xf32>
    %cst = arith.constant dense<0.000000e+00> : vector<8xf32>
    %1 = vector.multi_reduction <add>, %0, %cst [1] : vector<8x128xf32> to vector<8xf32>
    %2 = vector.shape_cast %1 : vector<8xf32> to vector<8x1xf32>
    %cst_1 = arith.constant 1.280000e+02 : f32
    %3 = vector.broadcast %cst_1 : f32 to vector<8x1xf32>
    %4 = arith.divf %2, %3 : vector<8x1xf32>
    %5 = vector.broadcast %4 : vector<8x1xf32> to vector<8x128xf32>
    %6 = arith.subf %0, %5 : vector<8x128xf32>
    %7 = arith.mulf %6, %6 : vector<8x128xf32>
    %cst_2 = arith.constant dense<0.000000e+00> : vector<8xf32>
    %8 = vector.multi_reduction <add>, %7, %cst_2 [1] : vector<8x128xf32> to vector<8xf32>
    %9 = vector.shape_cast %8 : vector<8xf32> to vector<8x1xf32>
    %cst_3 = arith.constant 1.280000e+02 : f32
    %10 = vector.broadcast %cst_3 : f32 to vector<8x1xf32>
    %11 = arith.divf %9, %10 : vector<8x1xf32>
    %cst_4 = arith.constant 9.99999974E-6 : f32
    %12 = vector.broadcast %cst_4 : f32 to vector<8x1xf32>
    %13 = arith.addf %11, %12 : vector<8x1xf32>
    %14 = math.rsqrt %13 : vector<8x1xf32>
    %15 = vector.broadcast %14 : vector<8x1xf32> to vector<8x128xf32>
    %16 = arith.mulf %6, %15 : vector<8x128xf32>
    %17 = arith.truncf %16 : vector<8x128xf32> to vector<8x128xbf16>
    %c0_5 = arith.constant 0 : index
    %c0_6 = arith.constant 0 : index
    %18 = vector.load %arg3[%c0_5, %c0_6] : memref<128x128xbf16, #tpu.memory_space<vmem>>, vector<128x128xbf16>
    %cst_7 = arith.constant dense<0.000000e+00> : vector<8x128xf32>
    %19 = tpu.matmul %17, %18, %cst_7 {dimension_numbers = #tpu.dot_dimension_numbers<[1], [0], [0], [1], [0, 0, 1, 1], [], []>} : vector<8x128xbf16>, vector<128x128xbf16>, vector<8x128xf32> -> vector<8x128xf32>
    %c0_8 = arith.constant 0 : index
    %c0_9 = arith.constant 0 : index
    %20 = vector.load %arg4[%c0_8, %c0_9] : memref<1x128xf32, #tpu.memory_space<vmem>>, vector<1x128xf32>
    %21 = vector.broadcast %20 : vector<1x128xf32> to vector<8x128xf32>
    %22 = arith.addf %19, %21 : vector<8x128xf32>
    %c0_10 = arith.constant 0 : index
    %c0_11 = arith.constant 0 : index
    %23 = vector.load %arg5[%c0_10, %c0_11] : memref<8x128xf32, #tpu.memory_space<vmem>>, vector<8x128xf32>
    tpu.vector_store %arg5[%c0_10, %c0_11], %22 {strides = array<i32>} : memref<8x128xf32, #tpu.memory_space<vmem>>, vector<8x128xf32>,
    return
  }
  func.func @transform_0(%arg0: i32, %arg1: i32) -> (i32, i32) {
    %c0_i32 = arith.constant 0 : i32
    %c0_i32_0 = arith.constant 0 : i32
    return %arg0, %c0_i32 : i32, i32
  }
  func.func @transform_1(%arg0: i32, %arg1: i32) -> (i32, i32) {
    %c0_i32 = arith.constant 0 : i32
    %c0_i32_0 = arith.constant 0 : i32
    return %c0_i32, %arg1 : i32, i32
  }
  func.func @transform_2(%arg0: i32, %arg1: i32) -> (i32, i32) {
    %c0_i32 = arith.constant 0 : i32
    %c0_i32_0 = arith.constant 0 : i32
    return %c0_i32, %arg1 : i32, i32
  }
  func.func @transform_3(%arg0: i32, %arg1: i32) -> (i32, i32) {
    %c0_i32 = arith.constant 0 : i32
    return %arg0, %arg1 : i32, i32
  }
}

module attributes {stable_mosaic.version = 11 : i64} {
  func.func @classifier_head_kernel(%arg0: i32, %arg1: i32, %arg2: memref<8x128xf32, #tpu.memory_space<vmem>>, %arg3: memref<128x128xbf16, #tpu.memory_space<vmem>>, %arg4: memref<1x128xf32, #tpu.memory_space<vmem>>, %arg5: memref<8x128xf32, #tpu.memory_space<vmem>>) attributes {dimension_semantics = [#tpu.dimension_semantics<parallel>, #tpu.dimension_semantics<parallel>], iteration_bounds = array<i64: 2, 1>, scalar_prefetch = 0 : i64, scratch_operands = 0 : i64, tpu.core_type = #tpu.core_type<tc>, window_params = [{transform_indices = @transform_0, window_bounds = array<i64: 8, 128>}, {transform_indices = @transform_1, window_bounds = array<i64: 128, 128>}, {transform_indices = @transform_2, window_bounds = array<i64: 1, 128>}, {transform_indices = @transform_3, window_bounds = array<i64: 8, 128>}]} {
    %c0 = arith.constant 0 : index
    %c0_0 = arith.constant 0 : index
    %0 = vector.load %arg2[%c0, %c0_0] : memref<8x128xf32, #tpu.memory_space<vmem>>, vector<8x128xf32>
    %cst = arith.constant dense<0.000000e+00> : vector<8xf32>
    %1 = vector.multi_reduction <add>, %0, %cst [1] : vector<8x128xf32> to vector<8xf32>
    %2 = vector.shape_cast %1 : vector<8xf32> to vector<8x1xf32>
    %cst_1 = arith.constant 1.280000e+02 : f32
    %3 = vector.broadcast %cst_1 : f32 to vector<8x1xf32>
    %4 = arith.divf %2, %3 : vector<8x1xf32>
    %5 = vector.broadcast %4 : vector<8x1xf32> to vector<8x128xf32>
    %6 = arith.subf %0, %5 : vector<8x128xf32>
    %7 = arith.mulf %6, %6 : vector<8x128xf32>
    %cst_2 = arith.constant dense<0.000000e+00> : vector<8xf32>
    %8 = vector.multi_reduction <add>, %7, %cst_2 [1] : vector<8x128xf32> to vector<8xf32>
    %9 = vector.shape_cast %8 : vector<8xf32> to vector<8x1xf32>
    %cst_3 = arith.constant 1.280000e+02 : f32
    %10 = vector.broadcast %cst_3 : f32 to vector<8x1xf32>
    %11 = arith.divf %9, %10 : vector<8x1xf32>
    %cst_4 = arith.constant 9.99999974E-6 : f32
    %12 = vector.broadcast %cst_4 : f32 to vector<8x1xf32>
    %13 = arith.addf %11, %12 : vector<8x1xf32>
    %14 = math.rsqrt %13 : vector<8x1xf32>
    %15 = vector.broadcast %14 : vector<8x1xf32> to vector<8x128xf32>
    %16 = arith.mulf %6, %15 : vector<8x128xf32>
    %17 = arith.truncf %16 : vector<8x128xf32> to vector<8x128xbf16>
    %c0_5 = arith.constant 0 : index
    %c0_6 = arith.constant 0 : index
    %18 = vector.load %arg3[%c0_5, %c0_6] : memref<128x128xbf16, #tpu.memory_space<vmem>>, vector<128x128xbf16>
    %cst_7 = arith.constant dense<0.000000e+00> : vector<8x128xf32>
    %19 = tpu.matmul %17, %18, %cst_7 {dimension_numbers = #tpu.dot_dimension_numbers<[1], [0], [0], [1], [0, 0, 1, 1], [], []>} : vector<8x128xbf16>, vector<128x128xbf16>, vector<8x128xf32> -> vector<8x128xf32>
    %c0_8 = arith.constant 0 : index
    %c0_9 = arith.constant 0 : index
    %20 = vector.load %arg4[%c0_8, %c0_9] : memref<1x128xf32, #tpu.memory_space<vmem>>, vector<1x128xf32>
    %21 = vector.broadcast %20 : vector<1x128xf32> to vector<8x128xf32>
    %22 = arith.addf %19, %21 : vector<8x128xf32>
    %c0_10 = arith.constant 0 : index
    %c0_11 = arith.constant 0 : index
    %23 = vector.load %arg5[%c0_10, %c0_11] : memref<8x128xf32, #tpu.memory_space<vmem>>, vector<8x128xf32>
    tpu.vector_store %arg5[%c0_10, %c0_11], %22 {strides = array<i32>} : memref<8x128xf32, #tpu.memory_space<vmem>>, vector<8x128xf32>,
    return
  }
  func.func @transform_0(%arg0: i32, %arg1: i32) -> (i32, i32) {
    %c0_i32 = arith.constant 0 : i32
    %c0_i32_0 = arith.constant 0 : i32
    return %arg0, %c0_i32 : i32, i32
  }
  func.func @transform_1(%arg0: i32, %arg1: i32) -> (i32, i32) {
    %c0_i32 = arith.constant 0 : i32
    %c0_i32_0 = arith.constant 0 : i32
    return %c0_i32, %arg1 : i32, i32
  }
  func.func @transform_2(%arg0: i32, %arg1: i32) -> (i32, i32) {
    %c0_i32 = arith.constant 0 : i32
    %c0_i32_0 = arith.constant 0 : i32
    return %c0_i32, %arg1 : i32, i32
  }
  func.func @transform_3(%arg0: i32, %arg1: i32) -> (i32, i32) {
    %c0_i32 = arith.constant 0 : i32
    return %arg0, %arg1 : i32, i32
  }
}

</mosaic_0001>

<bundles_post_ra>
// kernel: tpu_custom_call.1
= control target key start
LH: loop header
LB: loop body
LE: loop exit
PB: predicated region body
PF: predicated region fallthrough
CT: control target
= control target key end

     0   :  { %8 = vsyncpa [#allocation3], 0  ;;  %s1019_s0 = inlined_call_operand.hbm [shape: f32[16,1024], index: 0, kind: input, shape index: {}]   ;;  %s1020_s1 = inlined_call_operand.hbm [shape: bf16[128,128], index: 1, kind: input, shape index: {}]   ;;  %s1021_s2 = inlined_call_operand.vmem [shape: f32[1,128], index: 2, kind: input, shape index: {}]   ;;  %s1022_s3 = inlined_call_operand.hbm [shape: f32[16,128], index: 3, kind: output, shape index: {}]  }
   0x1   :  { %10 = vsyncpa [#allocation3 + $0x1], 0 }
   0x2   :  { %11 = vsyncpa [#allocation6], 0 }
   0x3   :  { %12 = vsyncpa [#allocation4], 0 }
   0x4   :  { %14 = vsyncpa [#allocation4 + $0x1], 0  ;;  %s798_s12 = smov 0   ;;  %s800_s13 = smov 0  }
   0x5   :  { %s802_s14 = smov 0   ;;  %s804_s15 = smov 0  }
   0x6   :  { %s806_s16 = smov 0   ;;  %s808_s17 = smov 0  }
   0x7 LB: > { %s482_s18 = sadd.s32 4294967295, %s769_s17   ;;  %s483_s19 = sadd.s32 4294967294, %s769_s17   ;;  %s769_s17 = sphi %s808_s17, %s20_s17   ;;  %s765_s16 = sphi %s806_s16, %s1046_s16   ;;  %s761_s15 = sphi %s804_s15, %s1045_s15   ;;  %s757_s14 = sphi %s802_s14, %s1044_s14   ;;  %s753_s13 = sphi %s800_s13, %s1043_s13   ;;  %s749_s12 = sphi %s798_s12, %s1042_s12  }
   0x8   : > { %p52_p0 = scmp.ne.s32.totalorder %s753_s13, %s749_s12  ;;  %p832_p1 = scmp.eq.s32.totalorder %s482_s18, 0 }
   0x9   : > { %p836_p2 = scmp.eq.s32.totalorder %s482_s18, 1  ;;  %p136_p3 = scmp.eq.s32.totalorder %s483_s19, 1 }
   0xa   : > { %s1027_s20 = scalar_select %p832_p1, 1, 0 }
   0xb   : > { %s1028_s21 = scalar_select %p836_p2, 1, 0 }
   0xc   : > { %p842_p4 = por %p832_p1, %p52_p0  ;;  %p484_p5 = scmp.ge.s32.totalorder %s769_s17, 1 }
   0xd   : > { %p847_p6 = por %p136_p3, %p52_p0  ;;  %p143_p7 = scmp.lt.s32.totalorder %s769_s17, 3 }
   0xe   : > { %s1029_s22 = scalar_select %p842_p4, 1, 0 }
   0xf   : > { %s1030_s23 = scalar_select %p847_p6, 1, 0 }
  0x10   : > { %p852_p8 = pnand %p484_p5, %p143_p7  ;;  %s771_s25 = smov [#allocation5]  }
  0x11   : > { %s157_s26 = sshll.u32 %s771_s25, 4  ;;  %s32_s28 = sadd.s32 1, %s765_s16  ;;  %s158_s26 = int_to_ptr.vmem [resolvable:$true] %s157_s26 }
  0x12   : > { %s1031_s24 = scalar_select %p852_p8, 1, 0 }
  0x13   : > { %p546_p9 = pneg %p852_p8  ;;  %s625_s4 = scalar_lea.hbm %s1020_s1, 1024 }
  0x14   : > { %p626_p12 = scmp.ne.s32.totalorder %s1020_s1, %s625_s4  ;;  %p632_p5 = scmp.lt.u32.totalorder %s625_s4, %s1020_s1 }
  0x15   : > { %p861_p11 = pnand %p546_p9, %p832_p1 }
  0x17   : > { %p627_p13 = pneg %p861_p11 }
  0x19   : > { %p628_p0 = pnand %p627_p13, %p626_p12 }
  0x1b   : > { %p629_p3 = pneg %p628_p0 }
  0x1d   : > { %p634_p7 = pnand %p632_p5, %p629_p3 }
  0x1f   : > { %637 = shalt.err (!%p634_p7)
}
  0x20   : > { %s638_s9 = scalar_lea.vmem %s158_s26, 1024  ;;  %p646_p1 = scmp.lt.s32.totalorder %s158_s26, %s158_s26 }
  0x21   : > { %p639_p9 = scmp.ne.s32.totalorder %s158_s26, %s638_s9  ;;  %p647_p4 = scmp.lt.s32.totalorder %s638_s9, %s638_s9 }
  0x23   : > { %p641_p10 = pnand %p639_p9, %p627_p13  ;;  %p648_p8 = por %p647_p4, %p646_p1 }
  0x25   : > { %p642_p6 = pneg %p641_p10 }
  0x27   : > { %p649_p2 = pnand %p648_p8, %p642_p6 }
  0x29   : > { %652 = shalt.err (!%p649_p2)
}
  0x2a   : > { %s772_s10 = smov 64   ;;  %s773_s11 = smov 4  }
  0x2b   : > { %549 = dma.hbm_to_vmem [thread:$0]  (!%p861_p11), %s1020_s1, 1024, %s158_s26, [#allocation6], %s772_s10, %s772_s10, %s773_s11  }
  0x2c   : > { %p34_p1 = scmp.ge.s32.totalorder %s32_s28, 2  ;;  %s39_s25 = sadd.s32 1, %s757_s14 }
  0x2d   : > { %p46_p2 = scmp.ne.s32.totalorder %s757_s14, %s753_s13  ;;  %p47_p4 = scmp.eq.s32.totalorder %s769_s17, 0 }
  0x2e   : > { %s1048_s28 = smov (%p34_p1, %s32_s28), 0  ;;  %p1034_p8 = scmp.ne.s32.totalorder %s1028_s21, 0 }
  0x2f   : > { %p888_p6 = por %p47_p4, %p46_p2  ;;  %s36_s27 = ssub.s32 %s765_s16, %s1048_s28 }
  0x30   : > { %p894_p10 = por %p1034_p8, %p46_p2  ;;  %p559_p12 = scmp.lt.s32.totalorder %s769_s17, 2 }
  0x31   : > { %p37_p11 = scmp.eq.s32.totalorder %s36_s27, 0  ;;  %s177_s26 = sand.u32 1, %s757_s14  }
  0x32   : > { %s488_s4 = sshll.u32 %s177_s26, 3  ;;  %s508_s6 = sshll.u32 %s765_s16, 10 }
  0x33   : > { %s903_s5 = scalar_select %p37_p11, %s757_s14, %s39_s25  }
  0x34   : > { %s909_s9 = scalar_lea.hbm %s1019_s0, %s508_s6  ;;  %s181_s21 = scalar_lea.vmem [#allocation2], %s488_s4 }
  0x35   : > { %s189_s10 = sshll.u32 %s181_s21, 4  ;;  %p915_p13 = pnand %p559_p12, %p888_p6  ;;  %s911_s10 = int_to_ptr.vmem [resolvable:$true] %s189_s10 }
  0x36   : > { %s178_s18 = scalar_lea.sflag [#allocation3], %s177_s26  ;;  %s653_s19 = scalar_lea.hbm %s909_s9, 128 }
  0x37   : > { %p654_p0 = scmp.ne.s32.totalorder %s909_s9, %s653_s19  ;;  %p655_p3 = pneg %p915_p13 }
  0x38   : > { %s658_s4 = scalar_lea.hbm %s1019_s0, 2048  ;;  %p659_p9 = scmp.lt.u32.totalorder %s909_s9, %s1019_s0 }
  0x39   : > { %p656_p5 = pnand %p655_p3, %p654_p0  ;;  %p660_p1 = scmp.lt.u32.totalorder %s658_s4, %s653_s19 }
  0x3a   : > { %p662_p4 = scmp.lt.u32.totalorder %s653_s19, %s909_s9 }
  0x3b   : > { %p657_p7 = pneg %p656_p5  ;;  %p661_p2 = por %p660_p1, %p659_p9 }
  0x3d   : > { %p663_p6 = por %p662_p4, %p661_p2 }
  0x3f   : > { %p664_p8 = pnand %p663_p6, %p657_p7 }
  0x41   : > { %667 = shalt.err (!%p664_p8)
}
  0x42   : > { %s668_s26 = scalar_lea.vmem %s911_s10, 128  ;;  %s774_s7 = smov [#allocation2]  }
  0x43   : > { %p669_p12 = scmp.ne.s32.totalorder %s911_s10, %s668_s26  ;;  %s673_s8 = sshll.u32 %s774_s7, 4  ;;  %s674_s8 = int_to_ptr.vmem [resolvable:$false] %s673_s8 }
  0x44   : > { %s675_s21 = scalar_lea.vmem %s674_s8, 256  ;;  %p676_p5 = scmp.lt.s32.totalorder %s911_s10, %s674_s8 }
  0x45   : > { %p671_p11 = pnand %p669_p12, %p655_p3  ;;  %p677_p9 = scmp.lt.s32.totalorder %s675_s21, %s668_s26 }
  0x47   : > { %p672_p0 = pneg %p671_p11  ;;  %p678_p1 = por %p677_p9, %p676_p5 }
  0x49   : > { %p679_p2 = pnand %p678_p1, %p672_p0 }
  0x4b   : > { %682 = shalt.err (!%p679_p2)
}
  0x4c   : > { %553 = dma.hbm_to_vmem [thread:$0]  (!%p915_p13), %s909_s9, 128, %s911_s10, %s178_s18  }
  0x4d   : > { %p1037_p7 = scmp.ne.s32.totalorder %s1031_s24, 0 }
  0x4e   : > { %s947_s19 = sand.u32 (!%p1037_p7), 1, %s753_s13   ;;  %p1038_p3 = scmp.ne.s32.totalorder (!%p1037_p7), %s1029_s22, 0 }
  0x4f   : > { %198 = sbr.rel (%p1037_p7) target bundleno = 628 (0x274), region = 32  ;;  %s492_s25 = sshll.u32 (!%p1037_p7), %s947_s19, 3 }
  0x50   : > { %s201_s27 = scalar_lea.sflag (!%p1037_p7), [#allocation3], %s947_s19  ;;  %s204_s4 = scalar_lea.vmem (!%p1037_p7), [#allocation2], %s492_s25 }
  0x56   : > { %736 = dma.done.wait (%p1038_p3), %s201_s27, 128  }
  0x57   : > { %738 = vsyncadd (%p1038_p3), %s201_s27, 4294967168  ;;  %p1039_p13 = scmp.ne.s32.totalorder %s1027_s20, 0 }
  0x59   : > { %740 = dma.done.wait (%p1039_p13), [#allocation6], 1024  }
  0x5a   : > { %742 = vsyncadd (%p1039_p13), [#allocation6], 4294966272  ;;  %v238_v0 = vld [vmem:[%s204_s4] sm:$0xff]  ;;  %v615_v1 = vld [vmem:[#allocation5] sm:$0xff]   ;;  %v775_v2 = vmov 0.0   ;;  %vm776_vm0 = vmmov 0  }
  0x5b   : > { %239 = vadd.xlane.f32.xlu0 %v238_v0  ;;  %518 = vmatprep.subr.bf16.mxu0 %v775_v2  ;;  %v616_v3 = vld [vmem:[#allocation5 + $0x8] sm:$0xff]   ;;  %v617_v4 = vld [vmem:[#allocation5 + $0x10] sm:$0xff]   ;;  %v618_v9 = vld [vmem:[#allocation5 + $0x18] sm:$0xff]   ;;  %s505_s24 = sshll.u32 %s761_s15, 7  ;;  %s233_s9 = scalar_lea.vmem [#allocation7], %s492_s25 }
  0x5c   : > { %519 = vmatpush3.bf16.msra.mxu0 %v615_v1  ;;  %v619_v10 = vld [vmem:[#allocation5 + $0x20] sm:$0xff]   ;;  %v620_v11 = vld [vmem:[#allocation5 + $0x28] sm:$0xff]   ;;  %534 = vmatprep.mubr.msk.bf16.mxu0 %vm776_vm0, %v775_v2  ;;  %v621_v12 = vld [vmem:[#allocation5 + $0x30] sm:$0xff]   ;;  %s379_s10 = sshll.u32 %s233_s9, 4  ;;  %s970_s29 = scalar_lea.hbm %s1022_s3, %s505_s24  ;;  %s972_s10 = int_to_ptr.vmem [resolvable:$true] %s379_s10 }
  0x5d   : > { %520 = vmatprep.subr.bf16.mxu0 %v775_v2  ;;  %v622_v13 = vld [vmem:[#allocation5 + $0x38] sm:$0xff]   ;;  %v495_v20 = vld [vmem:[%s1021_s2] ss:$0 sm:$0xff]  ;;  %s365_s15 = scalar_lea.sflag [#allocation4], %s947_s19  ;;  %s683_s6 = scalar_lea.vmem %s972_s10, 128 }
  0x5e   : > { %p684_p4 = scmp.ne.s32.totalorder %s972_s10, %s683_s6  ;;  %s777_s26 = smov [#allocation7]  }
  0x5f   : > { %s687_s7 = sshll.u32 %s777_s26, 4  ;;  %s688_s7 = int_to_ptr.vmem [resolvable:$false] %s687_s7 }
  0x60   : > { %521 = vmatpush3.bf16.msra.mxu0 %v616_v3  ;;  %p685_p6 = pnand %p684_p4, %p894_p10  ;;  %s689_s8 = scalar_lea.vmem %s688_s7, 256 }
  0x61   : > { %522 = vmatprep.subr.bf16.mxu0 %v775_v2  ;;  %p690_p12 = scmp.lt.s32.totalorder %s972_s10, %s688_s7  ;;  %p691_p11 = scmp.lt.s32.totalorder %s689_s8, %s683_s6 }
  0x62   : > { %p686_p8 = pneg %p685_p6 }
  0x63   : > { %p692_p0 = por %p691_p11, %p690_p12 }
  0x64   : > { %523 = vmatpush3.bf16.msra.mxu0 %v617_v4 }
  0x65   : > { %524 = vmatprep.subr.bf16.mxu0 %v775_v2  ;;  %p693_p5 = pnand %p692_p0, %p686_p8 }
  0x68   : > { %525 = vmatpush3.bf16.msra.mxu0 %v618_v9 }
  0x69   : > { %526 = vmatprep.subr.bf16.mxu0 %v775_v2 }
  0x6c   : > { %527 = vmatpush3.bf16.msra.mxu0 %v619_v10 }
  0x6d   : > { %528 = vmatprep.subr.bf16.mxu0 %v775_v2 }
  0x70   : > { %529 = vmatpush3.bf16.msra.mxu0 %v620_v11 }
  0x71   : > { %530 = vmatprep.subr.bf16.mxu0 %v775_v2 }
  0x74   : > { %531 = vmatpush3.bf16.msra.mxu0 %v621_v12 }
  0x75   : > { %532 = vmatprep.subr.bf16.mxu0 %v775_v2 }
  0x78   : > { %533 = vmatpush3.bf16.msra.mxu0 %v622_v13 }
  0xe8   : > { %v240_v5 = vpop.xlane.xlu0 %239 }
  0xe9   : > { %v242_v6 = vmul.f32 0.0078125, %v240_v5 }
  0xeb   : > { %v243_v7 = vsub.f32 %v238_v0, %v242_v6 }
  0xed   : > { %v244_v8 = vmul.f32 %v243_v7, %v243_v7 }
  0xef   : > { %245 = vadd.xlane.f32.xlu0 %v244_v8 }
 0x17c   : > { %v246_v14 = vpop.xlane.xlu0 %245 }
 0x17d   : > { %v247_v15 = vmul.f32 0.0078125, %v246_v14 }
 0x17f   : > { %v248_v16 = vadd.f32 1e-05, %v247_v15 }
 0x181   : > { %623 = vrsqrt.f32 %v248_v16 }
 0x18b   : > { %v624_v17 = vpop.eup %623 }
 0x18c   : > { %v250_v18 = vmul.f32 %v624_v17, %v243_v7 }
 0x18e   : > { %v251_v19 = vpack.c.bf16 %v250_v18, %v250_v18 }
 0x190   : > { %535 = vmatmul.mubr.bf16.vlgmr.msra.gmra.mrb[0].mxu0 %v251_v19 }
 0x263   : > { %v357_v21 = vpop.f32.mrb[0].mxu0 }
 0x264   : > { %v358_v22 = vadd.f32 %v495_v20, %v357_v21  ;;  %v536_v23 = vpop.f32.mrb[1].mxu0 }
 0x265   : > { %v360_v24 = vpop.f32.mrb[2].mxu0 }
 0x266   : > { %363 = vst [vmem:[%s233_s9] sm:$0xff] %v358_v22  ;;  %v537_v25 = vpop.f32.mrb[3].mxu0 }
 0x267   : > { %696 = shalt.err (!%p693_p5)
}
 0x268   : > { %s697_s21 = scalar_lea.hbm %s970_s29, 128  ;;  %s701_s27 = scalar_lea.hbm %s1022_s3, 256 }
 0x269   : > { %p698_p9 = scmp.ne.s32.totalorder %s970_s29, %s697_s21  ;;  %p702_p7 = scmp.lt.u32.totalorder %s970_s29, %s1022_s3 }
 0x26a   : > { %p703_p3 = scmp.lt.u32.totalorder %s701_s27, %s697_s21  ;;  %p705_p4 = scmp.lt.u32.totalorder %s697_s21, %s970_s29 }
 0x26b   : > { %p699_p1 = pnand %p698_p9, %p894_p10 }
 0x26c   : > { %p704_p13 = por %p703_p3, %p702_p7 }
 0x26d   : > { %p700_p2 = pneg %p699_p1 }
 0x26e   : > { %p706_p6 = por %p705_p4, %p704_p13 }
 0x270   : > { %p707_p8 = pnand %p706_p6, %p700_p2 }
 0x272   : > { %710 = shalt.err (!%p707_p8)
}
 0x273   : > { %544 = dma.vmem_to_hbm [thread:$0]  (%p894_p10), %s972_s10, 128, %s970_s29, %s365_s15  }
 0x274 PF: > { %s391_s22 = sand.u32 1, %s749_s12   ;;  %p1040_p12 = scmp.ne.s32.totalorder %s1030_s23, 0 }
 0x275   : > { %p1041_p11 = scmp.ge.s32.totalorder %s769_s17, 2  ;;  %s392_s24 = scalar_lea.sflag [#allocation4], %s391_s22 }
 0x277   : > { %p555_p0 = pnand %p1041_p11, %p1040_p12 }
 0x279   : > { %744 = dma.done.wait (!%p555_p0), %s392_s24, 128  }
 0x27a   : > { %746 = vsyncadd (!%p555_p0), %s392_s24, 4294967168  ;;  %s20_s17 = sadd.s32 1, %s769_s17   ;;  %s1042_s12 = smov %s753_s13 }
 0x27b   : > { %p17_p5 = scmp.ge.s32.totalorder %s20_s17, 4   ;;  %s1043_s13 = smov %s757_s14 }
 0x27c   : > { %s1044_s14 = smov %s903_s5  ;;  %s1045_s15 = smov %s765_s16 }
 0x27d   : > { %s1046_s16 = smov %s1048_s28  ;;  %19 = sbr.rel (!%p17_p5) target bundleno = 7 (0x7), region = 85 }
 0x284   :  { %397 = vsyncpa [#allocation3], 1 }
 0x285   :  { %399 = vsyncpa [#allocation3 + $0x1], 1 }
 0x286   :  { %400 = vsyncpa [#allocation6], 1 }
 0x287   :  { %401 = vsyncpa [#allocation4], 1 }
 0x288   :  { %403 = vsyncpa [#allocation4 + $0x1], 1 }

// kernel: tpu_custom_call.1
= control target key start
LH: loop header
LB: loop body
LE: loop exit
PB: predicated region body
PF: predicated region fallthrough
CT: control target
= control target key end

     0   :  { %8 = vsyncpa [#allocation3], 0  ;;  %s1019_s0 = inlined_call_operand.hbm [shape: f32[16,1024], index: 0, kind: input, shape index: {}]   ;;  %s1020_s1 = inlined_call_operand.hbm [shape: bf16[128,128], index: 1, kind: input, shape index: {}]   ;;  %s1021_s2 = inlined_call_operand.vmem [shape: f32[1,128], index: 2, kind: input, shape index: {}]   ;;  %s1022_s3 = inlined_call_operand.hbm [shape: f32[16,128], index: 3, kind: output, shape index: {}]  }
   0x1   :  { %10 = vsyncpa [#allocation3 + $0x1], 0 }
   0x2   :  { %11 = vsyncpa [#allocation6], 0 }
   0x3   :  { %12 = vsyncpa [#allocation4], 0 }
   0x4   :  { %14 = vsyncpa [#allocation4 + $0x1], 0  ;;  %s798_s12 = smov 0   ;;  %s800_s13 = smov 0  }
   0x5   :  { %s802_s14 = smov 0   ;;  %s804_s15 = smov 0  }
   0x6   :  { %s806_s16 = smov 0   ;;  %s808_s17 = smov 0  }
   0x7 LB: > { %s482_s18 = sadd.s32 4294967295, %s769_s17   ;;  %s483_s19 = sadd.s32 4294967294, %s769_s17   ;;  %s769_s17 = sphi %s808_s17, %s20_s17   ;;  %s765_s16 = sphi %s806_s16, %s1046_s16   ;;  %s761_s15 = sphi %s804_s15, %s1045_s15   ;;  %s757_s14 = sphi %s802_s14, %s1044_s14   ;;  %s753_s13 = sphi %s800_s13, %s1043_s13   ;;  %s749_s12 = sphi %s798_s12, %s1042_s12  }
   0x8   : > { %p52_p0 = scmp.ne.s32.totalorder %s753_s13, %s749_s12  ;;  %p832_p1 = scmp.eq.s32.totalorder %s482_s18, 0 }
   0x9   : > { %p836_p2 = scmp.eq.s32.totalorder %s482_s18, 1  ;;  %p136_p3 = scmp.eq.s32.totalorder %s483_s19, 1 }
   0xa   : > { %s1027_s20 = scalar_select %p832_p1, 1, 0 }
   0xb   : > { %s1028_s21 = scalar_select %p836_p2, 1, 0 }
   0xc   : > { %p842_p4 = por %p832_p1, %p52_p0  ;;  %p484_p5 = scmp.ge.s32.totalorder %s769_s17, 1 }
   0xd   : > { %p847_p6 = por %p136_p3, %p52_p0  ;;  %p143_p7 = scmp.lt.s32.totalorder %s769_s17, 3 }
   0xe   : > { %s1029_s22 = scalar_select %p842_p4, 1, 0 }
   0xf   : > { %s1030_s23 = scalar_select %p847_p6, 1, 0 }
  0x10   : > { %p852_p8 = pnand %p484_p5, %p143_p7  ;;  %s771_s25 = smov [#allocation5]  }
  0x11   : > { %s157_s26 = sshll.u32 %s771_s25, 4  ;;  %s32_s28 = sadd.s32 1, %s765_s16  ;;  %s158_s26 = int_to_ptr.vmem [resolvable:$true] %s157_s26 }
  0x12   : > { %s1031_s24 = scalar_select %p852_p8, 1, 0 }
  0x13   : > { %p546_p9 = pneg %p852_p8  ;;  %s625_s4 = scalar_lea.hbm %s1020_s1, 1024 }
  0x14   : > { %p626_p12 = scmp.ne.s32.totalorder %s1020_s1, %s625_s4  ;;  %p632_p5 = scmp.lt.u32.totalorder %s625_s4, %s1020_s1 }
  0x15   : > { %p861_p11 = pnand %p546_p9, %p832_p1 }
  0x17   : > { %p627_p13 = pneg %p861_p11 }
  0x19   : > { %p628_p0 = pnand %p627_p13, %p626_p12 }
  0x1b   : > { %p629_p3 = pneg %p628_p0 }
  0x1d   : > { %p634_p7 = pnand %p632_p5, %p629_p3 }
  0x1f   : > { %637 = shalt.err (!%p634_p7)
}
  0x20   : > { %s638_s9 = scalar_lea.vmem %s158_s26, 1024  ;;  %p646_p1 = scmp.lt.s32.totalorder %s158_s26, %s158_s26 }
  0x21   : > { %p639_p9 = scmp.ne.s32.totalorder %s158_s26, %s638_s9  ;;  %p647_p4 = scmp.lt.s32.totalorder %s638_s9, %s638_s9 }
  0x23   : > { %p641_p10 = pnand %p639_p9, %p627_p13  ;;  %p648_p8 = por %p647_p4, %p646_p1 }
  0x25   : > { %p642_p6 = pneg %p641_p10 }
  0x27   : > { %p649_p2 = pnand %p648_p8, %p642_p6 }
  0x29   : > { %652 = shalt.err (!%p649_p2)
}
  0x2a   : > { %s772_s10 = smov 64   ;;  %s773_s11 = smov 4  }
  0x2b   : > { %549 = dma.hbm_to_vmem [thread:$0]  (!%p861_p11), %s1020_s1, 1024, %s158_s26, [#allocation6], %s772_s10, %s772_s10, %s773_s11  }
  0x2c   : > { %p34_p1 = scmp.ge.s32.totalorder %s32_s28, 2  ;;  %s39_s25 = sadd.s32 1, %s757_s14 }
  0x2d   : > { %p46_p2 = scmp.ne.s32.totalorder %s757_s14, %s753_s13  ;;  %p47_p4 = scmp.eq.s32.totalorder %s769_s17, 0 }
  0x2e   : > { %s1048_s28 = smov (%p34_p1, %s32_s28), 0  ;;  %p1034_p8 = scmp.ne.s32.totalorder %s1028_s21, 0 }
  0x2f   : > { %p888_p6 = por %p47_p4, %p46_p2  ;;  %s36_s27 = ssub.s32 %s765_s16, %s1048_s28 }
  0x30   : > { %p894_p10 = por %p1034_p8, %p46_p2  ;;  %p559_p12 = scmp.lt.s32.totalorder %s769_s17, 2 }
  0x31   : > { %p37_p11 = scmp.eq.s32.totalorder %s36_s27, 0  ;;  %s177_s26 = sand.u32 1, %s757_s14  }
  0x32   : > { %s488_s4 = sshll.u32 %s177_s26, 3  ;;  %s508_s6 = sshll.u32 %s765_s16, 10 }
  0x33   : > { %s903_s5 = scalar_select %p37_p11, %s757_s14, %s39_s25  }
  0x34   : > { %s909_s9 = scalar_lea.hbm %s1019_s0, %s508_s6  ;;  %s181_s21 = scalar_lea.vmem [#allocation2], %s488_s4 }
  0x35   : > { %s189_s10 = sshll.u32 %s181_s21, 4  ;;  %p915_p13 = pnand %p559_p12, %p888_p6  ;;  %s911_s10 = int_to_ptr.vmem [resolvable:$true] %s189_s10 }
  0x36   : > { %s178_s18 = scalar_lea.sflag [#allocation3], %s177_s26  ;;  %s653_s19 = scalar_lea.hbm %s909_s9, 128 }
  0x37   : > { %p654_p0 = scmp.ne.s32.totalorder %s909_s9, %s653_s19  ;;  %p655_p3 = pneg %p915_p13 }
  0x38   : > { %s658_s4 = scalar_lea.hbm %s1019_s0, 2048  ;;  %p659_p9 = scmp.lt.u32.totalorder %s909_s9, %s1019_s0 }
  0x39   : > { %p656_p5 = pnand %p655_p3, %p654_p0  ;;  %p660_p1 = scmp.lt.u32.totalorder %s658_s4, %s653_s19 }
  0x3a   : > { %p662_p4 = scmp.lt.u32.totalorder %s653_s19, %s909_s9 }
  0x3b   : > { %p657_p7 = pneg %p656_p5  ;;  %p661_p2 = por %p660_p1, %p659_p9 }
  0x3d   : > { %p663_p6 = por %p662_p4, %p661_p2 }
  0x3f   : > { %p664_p8 = pnand %p663_p6, %p657_p7 }
  0x41   : > { %667 = shalt.err (!%p664_p8)
}
  0x42   : > { %s668_s26 = scalar_lea.vmem %s911_s10, 128  ;;  %s774_s7 = smov [#allocation2]  }
  0x43   : > { %p669_p12 = scmp.ne.s32.totalorder %s911_s10, %s668_s26  ;;  %s673_s8 = sshll.u32 %s774_s7, 4  ;;  %s674_s8 = int_to_ptr.vmem [resolvable:$false] %s673_s8 }
  0x44   : > { %s675_s21 = scalar_lea.vmem %s674_s8, 256  ;;  %p676_p5 = scmp.lt.s32.totalorder %s911_s10, %s674_s8 }
  0x45   : > { %p671_p11 = pnand %p669_p12, %p655_p3  ;;  %p677_p9 = scmp.lt.s32.totalorder %s675_s21, %s668_s26 }
  0x47   : > { %p672_p0 = pneg %p671_p11  ;;  %p678_p1 = por %p677_p9, %p676_p5 }
  0x49   : > { %p679_p2 = pnand %p678_p1, %p672_p0 }
  0x4b   : > { %682 = shalt.err (!%p679_p2)
}
  0x4c   : > { %553 = dma.hbm_to_vmem [thread:$0]  (!%p915_p13), %s909_s9, 128, %s911_s10, %s178_s18  }
  0x4d   : > { %p1037_p7 = scmp.ne.s32.totalorder %s1031_s24, 0 }
  0x4e   : > { %s947_s19 = sand.u32 (!%p1037_p7), 1, %s753_s13   ;;  %p1038_p3 = scmp.ne.s32.totalorder (!%p1037_p7), %s1029_s22, 0 }
  0x4f   : > { %198 = sbr.rel (%p1037_p7) target bundleno = 628 (0x274), region = 32  ;;  %s492_s25 = sshll.u32 (!%p1037_p7), %s947_s19, 3 }
  0x50   : > { %s201_s27 = scalar_lea.sflag (!%p1037_p7), [#allocation3], %s947_s19  ;;  %s204_s4 = scalar_lea.vmem (!%p1037_p7), [#allocation2], %s492_s25 }
  0x56   : > { %736 = dma.done.wait (%p1038_p3), %s201_s27, 128  }
  0x57   : > { %738 = vsyncadd (%p1038_p3), %s201_s27, 4294967168  ;;  %p1039_p13 = scmp.ne.s32.totalorder %s1027_s20, 0 }
  0x59   : > { %740 = dma.done.wait (%p1039_p13), [#allocation6], 1024  }
  0x5a   : > { %742 = vsyncadd (%p1039_p13), [#allocation6], 4294966272  ;;  %v238_v0 = vld [vmem:[%s204_s4] sm:$0xff]  ;;  %v615_v1 = vld [vmem:[#allocation5] sm:$0xff]   ;;  %v775_v2 = vmov 0.0   ;;  %vm776_vm0 = vmmov 0  }
  0x5b   : > { %239 = vadd.xlane.f32.xlu0 %v238_v0  ;;  %518 = vmatprep.subr.bf16.mxu0 %v775_v2  ;;  %v616_v3 = vld [vmem:[#allocation5 + $0x8] sm:$0xff]   ;;  %v617_v4 = vld [vmem:[#allocation5 + $0x10] sm:$0xff]   ;;  %v618_v9 = vld [vmem:[#allocation5 + $0x18] sm:$0xff]   ;;  %s505_s24 = sshll.u32 %s761_s15, 7  ;;  %s233_s9 = scalar_lea.vmem [#allocation7], %s492_s25 }
  0x5c   : > { %519 = vmatpush3.bf16.msra.mxu0 %v615_v1  ;;  %v619_v10 = vld [vmem:[#allocation5 + $0x20] sm:$0xff]   ;;  %v620_v11 = vld [vmem:[#allocation5 + $0x28] sm:$0xff]   ;;  %534 = vmatprep.mubr.msk.bf16.mxu0 %vm776_vm0, %v775_v2  ;;  %v621_v12 = vld [vmem:[#allocation5 + $0x30] sm:$0xff]   ;;  %s379_s10 = sshll.u32 %s233_s9, 4  ;;  %s970_s29 = scalar_lea.hbm %s1022_s3, %s505_s24  ;;  %s972_s10 = int_to_ptr.vmem [resolvable:$true] %s379_s10 }
  0x5d   : > { %520 = vmatprep.subr.bf16.mxu0 %v775_v2  ;;  %v622_v13 = vld [vmem:[#allocation5 + $0x38] sm:$0xff]   ;;  %v495_v20 = vld [vmem:[%s1021_s2] ss:$0 sm:$0xff]  ;;  %s365_s15 = scalar_lea.sflag [#allocation4], %s947_s19  ;;  %s683_s6 = scalar_lea.vmem %s972_s10, 128 }
  0x5e   : > { %p684_p4 = scmp.ne.s32.totalorder %s972_s10, %s683_s6  ;;  %s777_s26 = smov [#allocation7]  }
  0x5f   : > { %s687_s7 = sshll.u32 %s777_s26, 4  ;;  %s688_s7 = int_to_ptr.vmem [resolvable:$false] %s687_s7 }
  0x60   : > { %521 = vmatpush3.bf16.msra.mxu0 %v616_v3  ;;  %p685_p6 = pnand %p684_p4, %p894_p10  ;;  %s689_s8 = scalar_lea.vmem %s688_s7, 256 }
  0x61   : > { %522 = vmatprep.subr.bf16.mxu0 %v775_v2  ;;  %p690_p12 = scmp.lt.s32.totalorder %s972_s10, %s688_s7  ;;  %p691_p11 = scmp.lt.s32.totalorder %s689_s8, %s683_s6 }
  0x62   : > { %p686_p8 = pneg %p685_p6 }
  0x63   : > { %p692_p0 = por %p691_p11, %p690_p12 }
  0x64   : > { %523 = vmatpush3.bf16.msra.mxu0 %v617_v4 }
  0x65   : > { %524 = vmatprep.subr.bf16.mxu0 %v775_v2  ;;  %p693_p5 = pnand %p692_p0, %p686_p8 }
  0x68   : > { %525 = vmatpush3.bf16.msra.mxu0 %v618_v9 }
  0x69   : > { %526 = vmatprep.subr.bf16.mxu0 %v775_v2 }
  0x6c   : > { %527 = vmatpush3.bf16.msra.mxu0 %v619_v10 }
  0x6d   : > { %528 = vmatprep.subr.bf16.mxu0 %v775_v2 }
  0x70   : > { %529 = vmatpush3.bf16.msra.mxu0 %v620_v11 }
  0x71   : > { %530 = vmatprep.subr.bf16.mxu0 %v775_v2 }
  0x74   : > { %531 = vmatpush3.bf16.msra.mxu0 %v621_v12 }
  0x75   : > { %532 = vmatprep.subr.bf16.mxu0 %v775_v2 }
  0x78   : > { %533 = vmatpush3.bf16.msra.mxu0 %v622_v13 }
  0xe8   : > { %v240_v5 = vpop.xlane.xlu0 %239 }
  0xe9   : > { %v242_v6 = vmul.f32 0.0078125, %v240_v5 }
  0xeb   : > { %v243_v7 = vsub.f32 %v238_v0, %v242_v6 }
  0xed   : > { %v244_v8 = vmul.f32 %v243_v7, %v243_v7 }
  0xef   : > { %245 = vadd.xlane.f32.xlu0 %v244_v8 }
 0x17c   : > { %v246_v14 = vpop.xlane.xlu0 %245 }
 0x17d   : > { %v247_v15 = vmul.f32 0.0078125, %v246_v14 }
 0x17f   : > { %v248_v16 = vadd.f32 1e-05, %v247_v15 }
 0x181   : > { %623 = vrsqrt.f32 %v248_v16 }
 0x18b   : > { %v624_v17 = vpop.eup %623 }
 0x18c   : > { %v250_v18 = vmul.f32 %v624_v17, %v243_v7 }
 0x18e   : > { %v251_v19 = vpack.c.bf16 %v250_v18, %v250_v18 }
 0x190   : > { %535 = vmatmul.mubr.bf16.vlgmr.msra.gmra.mrb[0].mxu0 %v251_v19 }
 0x263   : > { %v357_v21 = vpop.f32.mrb[0].mxu0 }
 0x264   : > { %v358_v22 = vadd.f32 %v495_v20, %v357_v21  ;;  %v536_v23 = vpop.f32.mrb[1].mxu0 }
 0x265   : > { %v360_v24 = vpop.f32.mrb[2].mxu0 }
 0x266   : > { %363 = vst [vmem:[%s233_s9] sm:$0xff] %v358_v22  ;;  %v537_v25 = vpop.f32.mrb[3].mxu0 }
 0x267   : > { %696 = shalt.err (!%p693_p5)
}
 0x268   : > { %s697_s21 = scalar_lea.hbm %s970_s29, 128  ;;  %s701_s27 = scalar_lea.hbm %s1022_s3, 256 }
 0x269   : > { %p698_p9 = scmp.ne.s32.totalorder %s970_s29, %s697_s21  ;;  %p702_p7 = scmp.lt.u32.totalorder %s970_s29, %s1022_s3 }
 0x26a   : > { %p703_p3 = scmp.lt.u32.totalorder %s701_s27, %s697_s21  ;;  %p705_p4 = scmp.lt.u32.totalorder %s697_s21, %s970_s29 }
 0x26b   : > { %p699_p1 = pnand %p698_p9, %p894_p10 }
 0x26c   : > { %p704_p13 = por %p703_p3, %p702_p7 }
 0x26d   : > { %p700_p2 = pneg %p699_p1 }
 0x26e   : > { %p706_p6 = por %p705_p4, %p704_p13 }
 0x270   : > { %p707_p8 = pnand %p706_p6, %p700_p2 }
 0x272   : > { %710 = shalt.err (!%p707_p8)
}
 0x273   : > { %544 = dma.vmem_to_hbm [thread:$0]  (%p894_p10), %s972_s10, 128, %s970_s29, %s365_s15  }
 0x274 PF: > { %s391_s22 = sand.u32 1, %s749_s12   ;;  %p1040_p12 = scmp.ne.s32.totalorder %s1030_s23, 0 }
 0x275   : > { %p1041_p11 = scmp.ge.s32.totalorder %s769_s17, 2  ;;  %s392_s24 = scalar_lea.sflag [#allocation4], %s391_s22 }
 0x277   : > { %p555_p0 = pnand %p1041_p11, %p1040_p12 }
 0x279   : > { %744 = dma.done.wait (!%p555_p0), %s392_s24, 128  }
 0x27a   : > { %746 = vsyncadd (!%p555_p0), %s392_s24, 4294967168  ;;  %s20_s17 = sadd.s32 1, %s769_s17   ;;  %s1042_s12 = smov %s753_s13 }
 0x27b   : > { %p17_p5 = scmp.ge.s32.totalorder %s20_s17, 4   ;;  %s1043_s13 = smov %s757_s14 }
 0x27c   : > { %s1044_s14 = smov %s903_s5  ;;  %s1045_s15 = smov %s765_s16 }
 0x27d   : > { %s1046_s16 = smov %s1048_s28  ;;  %19 = sbr.rel (!%p17_p5) target bundleno = 7 (0x7), region = 85 }
 0x284   :  { %397 = vsyncpa [#allocation3], 1 }
 0x285   :  { %399 = vsyncpa [#allocation3 + $0x1], 1 }
 0x286   :  { %400 = vsyncpa [#allocation6], 1 }
 0x287   :  { %401 = vsyncpa [#allocation4], 1 }
 0x288   :  { %403 = vsyncpa [#allocation4 + $0x1], 1 }

</bundles_post_ra>
